<compile_context>
chip_gen: v7x
topology: tpu7x:2x2x1
jax: 0.10.0
libtpu: 0.0.40
codegen_flags: <defaults>
</compile_context>

<pallas_src>
import functools

import jax
import jax.numpy as jnp
from jax import lax
from jax.experimental import pallas as pl
from jax.experimental.pallas import tpu as pltpu


# ----------------------------------------------------------------------------
# Kernels
# ----------------------------------------------------------------------------
def _ece_lanedense_kernel(logits_ref, labels_ref,
                          conf_out, acc_out, cnt_out,
                          conf_sum, acc_sum, cnt_sum,
                          *, n_total, inner_chunks, n_bins):
    """Small-C path: logits presented as (C, tile_n), labels as (1, tile_n)."""
    p = pl.program_id(0)          # megacore (parallel) axis
    i = pl.program_id(1)          # sequential reduction axis

    @pl.when(i == 0)
    def _init():
        conf_sum[...] = jnp.zeros_like(conf_sum)
        acc_sum[...] = jnp.zeros_like(acc_sum)
        cnt_sum[...] = jnp.zeros_like(cnt_sum)

    logits = logits_ref[...].astype(jnp.float32)               # (C, TC)
    n_cls, tile_cols = logits.shape

    # confidence = max softmax prob = exp(0)/Z = 1/Z ; reductions over sublanes.
    col_max = jnp.max(logits, axis=0, keepdims=True)            # (1, TC)
    z = jnp.sum(jnp.exp(logits - col_max), axis=0, keepdims=True)
    conf = 1.0 / z              # exact divide: keeps parity with softmax-max
    # prediction = first argmax of the raw logits (same ordering as softmax).
    cls_idx = lax.broadcasted_iota(jnp.int32, logits.shape, 0)
    pred = jnp.min(jnp.where(logits == col_max, cls_idx, n_cls),
                   axis=0, keepdims=True)                        # (1, TC)
    acc = (pred == labels_ref[...]).astype(jnp.float32)          # (1, TC)

    # Mask columns past N (ragged last block / clamped padded block).  Zeroing
    # conf both removes NaN/Inf from garbage padding AND drops those columns
    # from every bin (bin 0's lower bound is a strict > 0 compare).
    col_base = (p * inner_chunks + i) * tile_cols
    col_id = col_base + lax.broadcasted_iota(jnp.int32, (1, tile_cols), 1)
    conf = jnp.where(col_id < n_total, conf, 0.0)

    # Uniform bin boundaries, same semantics as torch.linspace comparisons.
    bin_f = lax.broadcasted_iota(jnp.int32, (n_bins, 1), 0).astype(jnp.float32)
    lowers = bin_f / n_bins
    uppers = (bin_f + 1.0) / n_bins
    in_bin = ((conf > lowers) & (conf <= uppers)).astype(jnp.float32)  # (NB, TC)

    conf_sum[...] += jnp.sum(in_bin * conf, axis=1, keepdims=True)     # (NB, 1)
    acc_sum[...] += jnp.sum(in_bin * acc, axis=1, keepdims=True)
    cnt_sum[...] += jnp.sum(in_bin, axis=1, keepdims=True)

    @pl.when(i == pl.num_programs(1) - 1)
    def _finalize():
        conf_out[...] = conf_sum[...][None]
        acc_out[...] = acc_sum[...][None]
        cnt_out[...] = cnt_sum[...][None]


def _ece_rowmajor_kernel(logits_ref, labels_ref,
                         conf_out, acc_out, cnt_out,
                         conf_sum, acc_sum, cnt_sum,
                         *, n_total, inner_chunks, n_bins):
    """Large-C path: logits as (tile_rows, C), labels as (tile_rows, 1)."""
    p = pl.program_id(0)
    i = pl.program_id(1)

    @pl.when(i == 0)
    def _init():
        conf_sum[...] = jnp.zeros_like(conf_sum)
        acc_sum[...] = jnp.zeros_like(acc_sum)
        cnt_sum[...] = jnp.zeros_like(cnt_sum)

    logits = logits_ref[...].astype(jnp.float32)               # (TR, C)
    tile_rows, n_cls = logits.shape

    row_max = jnp.max(logits, axis=1, keepdims=True)             # (TR, 1)
    z = jnp.sum(jnp.exp(logits - row_max), axis=1, keepdims=True)
    conf = 1.0 / z
    cls_idx = lax.broadcasted_iota(jnp.int32, logits.shape, 1)
    pred = jnp.min(jnp.where(logits == row_max, cls_idx, n_cls),
                   axis=1, keepdims=True)                        # (TR, 1)
    acc = (pred == labels_ref[...]).astype(jnp.float32)          # (TR, 1)

    row_base = (p * inner_chunks + i) * tile_rows
    row_id = row_base + lax.broadcasted_iota(jnp.int32, (tile_rows, 1), 0)
    conf = jnp.where(row_id < n_total, conf, 0.0)

    bin_f = lax.broadcasted_iota(jnp.int32, (1, n_bins), 1).astype(jnp.float32)
    lowers = bin_f / n_bins
    uppers = (bin_f + 1.0) / n_bins
    in_bin = ((conf > lowers) & (conf <= uppers)).astype(jnp.float32)  # (TR, NB)

    conf_sum[...] += jnp.sum(in_bin * conf, axis=0, keepdims=True)     # (1, NB)
    acc_sum[...] += jnp.sum(in_bin * acc, axis=0, keepdims=True)
    cnt_sum[...] += jnp.sum(in_bin, axis=0, keepdims=True)

    @pl.when(i == pl.num_programs(1) - 1)
    def _finalize():
        conf_out[...] = conf_sum[...][None]
        acc_out[...] = acc_sum[...][None]
        cnt_out[...] = cnt_sum[...][None]


# ----------------------------------------------------------------------------
# Tiling / VMEM budget helpers
# ----------------------------------------------------------------------------
def _tpu_vmem_budget():
    """(tile budget, vmem_limit_bytes) scaled to the part's VMEM."""
    try:
        cap = int(pltpu.get_tpu_info().vmem_capacity_bytes)
    except Exception:
        cap = 64 * 1024 * 1024
    if cap >= 100 * 1024 * 1024:          # v5e / v6e: 128 MiB physical VMEM
        return 64 * 1024 * 1024, 96 * 1024 * 1024
    # v7x (64 MiB per TensorCore) or unknown: stay conservative.
    return 24 * 1024 * 1024, 32 * 1024 * 1024


def _pick_tile_cols(n, c, itemsize, budget):
    """Column (sample) tile for the lane-dense small-C path, padded-byte aware."""
    g = 32 // itemsize                                  # sublane packing granule
    c_pad = ((c + g - 1) // g) * g
    per_col = (2 * c_pad * itemsize                     # double-buffered logits
               + 2 * 8 * 4                              # double-buffered (1,·) i32 labels
               + 4 * max(c_pad, 8) * 4                  # f32 cast / exp temporaries
               + 3 * 16 * 4)                            # (NB,·) in_bin + products
    max_cols = max(128, budget // per_col)
    if n <= max_cols and n <= 65536:
        return n
    tile = min(max_cols, 32768, n)
    return max(128, (tile // 128) * 128)


def _pick_tile_rows(n, c, itemsize, budget):
    """Row tile for the row-major large-C path, lane-padded-byte aware."""
    c_lane = ((c + 127) // 128) * 128
    per_row = (2 * c_lane * itemsize                    # double-buffered logits
               + 2 * 128 * 4                            # double-buffered (·,1) i32 labels
               + 3 * c_lane * 4                         # f32 cast / exp temporaries
               + 2 * 128 * 4)                           # (·,NB) in_bin + products
    max_rows = max(8, budget // per_row)
    if n <= max_rows and n <= 8192:
        return n
    tile = min(max_rows, 8192, n)
    return max(8, (tile // 8) * 8)


# ----------------------------------------------------------------------------
# pallas_call wrappers
# ----------------------------------------------------------------------------
def _run_lanedense(logits_t, labels_row, *, n_bins, tile, n_total, n_par,
                   inner_chunks, total_chunks, vmem_limit):
    c = logits_t.shape[0]
    kernel = functools.partial(_ece_lanedense_kernel, n_total=n_total,
                               inner_chunks=inner_chunks, n_bins=n_bins)

    def col_map(p, i):
        # Clamp so the padded chunk of an odd split re-reads the last real
        # block; the kernel masks it out via col_id >= n_total.
        return (0, jnp.minimum(p * inner_chunks + i, total_chunks - 1))

    out_map = lambda p, i: (p, 0, 0)
    stat_shape = jax.ShapeDtypeStruct((n_par, n_bins, 1), jnp.float32)

    conf_p, acc_p, cnt_p = pl.pallas_call(
        kernel,
        out_shape=(stat_shape, stat_shape, stat_shape),
        grid_spec=pltpu.PrefetchScalarGridSpec(
            num_scalar_prefetch=0,
            grid=(n_par, inner_chunks),
            in_specs=[
                pl.BlockSpec((c, tile), col_map),       # native-dtype logits
                pl.BlockSpec((1, tile), col_map),       # lane-dense labels
            ],
            out_specs=(
                pl.BlockSpec((1, n_bins, 1), out_map),
                pl.BlockSpec((1, n_bins, 1), out_map),
                pl.BlockSpec((1, n_bins, 1), out_map),
            ),
            scratch_shapes=[
                pltpu.VMEM((n_bins, 1), jnp.float32),
                pltpu.VMEM((n_bins, 1), jnp.float32),
                pltpu.VMEM((n_bins, 1), jnp.float32),
            ],
        ),
        compiler_params=pltpu.CompilerParams(
            dimension_semantics=("parallel", "arbitrary"),
            vmem_limit_bytes=vmem_limit),
    )(logits_t, labels_row)

    return (jnp.sum(conf_p, axis=0).reshape(n_bins),
            jnp.sum(acc_p, axis=0).reshape(n_bins),
            jnp.sum(cnt_p, axis=0).reshape(n_bins))


def _run_rowmajor(logits, labels_col, *, n_bins, tile, n_total, n_par,
                  inner_chunks, total_chunks, vmem_limit):
    c = logits.shape[1]
    kernel = functools.partial(_ece_rowmajor_kernel, n_total=n_total,
                               inner_chunks=inner_chunks, n_bins=n_bins)

    def row_map(p, i):
        return (jnp.minimum(p * inner_chunks + i, total_chunks - 1), 0)

    out_map = lambda p, i: (p, 0, 0)
    stat_shape = jax.ShapeDtypeStruct((n_par, 1, n_bins), jnp.float32)

    conf_p, acc_p, cnt_p = pl.pallas_call(
        kernel,
        out_shape=(stat_shape, stat_shape, stat_shape),
        grid_spec=pltpu.PrefetchScalarGridSpec(
            num_scalar_prefetch=0,
            grid=(n_par, inner_chunks),
            in_specs=[
                pl.BlockSpec((tile, c), row_map),
                pl.BlockSpec((tile, 1), row_map),
            ],
            out_specs=(
                pl.BlockSpec((1, 1, n_bins), out_map),
                pl.BlockSpec((1, 1, n_bins), out_map),
                pl.BlockSpec((1, 1, n_bins), out_map),
            ),
            scratch_shapes=[
                pltpu.VMEM((1, n_bins), jnp.float32),
                pltpu.VMEM((1, n_bins), jnp.float32),
                pltpu.VMEM((1, n_bins), jnp.float32),
            ],
        ),
        compiler_params=pltpu.CompilerParams(
            dimension_semantics=("parallel", "arbitrary"),
            vmem_limit_bytes=vmem_limit),
    )(logits, labels_col)

    return (jnp.sum(conf_p, axis=0).reshape(n_bins),
            jnp.sum(acc_p, axis=0).reshape(n_bins),
            jnp.sum(cnt_p, axis=0).reshape(n_bins))


# ----------------------------------------------------------------------------
# Public entry point
# ----------------------------------------------------------------------------
@functools.partial(jax.jit, static_argnames=("n_bins", "_tile_override"))
def ece_loss(logits, labels, n_bins=15, _tile_override=None):
    """Pallas TPU implementation of ECELoss.forward.

    logits: (N, C) any float dtype, labels: (N,) int. Returns (1,) float32.
    `_tile_override` is a test-only knob to force a specific tile size.
    """
    n, c = logits.shape
    itemsize = jnp.dtype(logits.dtype).itemsize
    budget, vmem_limit = _tpu_vmem_budget()
    labels_i32 = labels.astype(jnp.int32)

    if c < 128:
        # Lane-dense path: wrapper-level transpose so classes sit on sublanes.
        tile = _tile_override or _pick_tile_cols(n, c, itemsize, budget)
        tile = min(tile, n)
        total_chunks = -(-n // tile)
        n_par = 2 if total_chunks >= 2 else 1        # always split on v7x megacore
        inner_chunks = -(-total_chunks // n_par)
        conf_sum, acc_sum, cnt = _run_lanedense(
            jnp.transpose(logits), labels_i32.reshape(1, n),
            n_bins=n_bins, tile=tile, n_total=n, n_par=n_par,
            inner_chunks=inner_chunks, total_chunks=total_chunks,
            vmem_limit=vmem_limit)
    else:
        # Row-major path: already lane-dense per sample, stays HBM-bound.
        tile = _tile_override or _pick_tile_rows(n, c, itemsize, budget)
        tile = min(tile, n)
        total_chunks = -(-n // tile)
        n_par = 2 if total_chunks >= 2 else 1
        inner_chunks = -(-total_chunks // n_par)
        conf_sum, acc_sum, cnt = _run_rowmajor(
            logits, labels_i32.reshape(n, 1),
            n_bins=n_bins, tile=tile, n_total=n, n_par=n_par,
            inner_chunks=inner_chunks, total_chunks=total_chunks,
            vmem_limit=vmem_limit)

    # Tiny (n_bins,) epilogue: ece = sum_b |avg_conf_b - avg_acc_b| * prop_b
    # over non-empty bins (the `.item() > 0` gate becomes a masked select).
    nonzero = cnt > 0.0
    safe_cnt = jnp.maximum(cnt, 1.0)
    prop = cnt / jnp.float32(n)
    ece = jnp.sum(jnp.where(nonzero,
                            jnp.abs(conf_sum / safe_cnt - acc_sum / safe_cnt) * prop,
                            0.0))
    return ece.reshape(1)


# ----------------------------------------------------------------------------
# Pure-JAX reference (mirrors the PyTorch loop)
# ----------------------------------------------------------------------------
def _ece_reference(logits, labels, n_bins=15):
    sm = jax.nn.softmax(logits, axis=1)
    conf = jnp.max(sm, axis=1)
    pred = jnp.argmax(sm, axis=1)
    acc = (pred == labels).astype(jnp.float32)
    bounds = jnp.linspace(0.0, 1.0, n_bins + 1, dtype=jnp.float32)
    ece = jnp.zeros((1,), jnp.float32)
    for b in range(n_bins):
        in_bin = (conf > bounds[b]) & (conf <= bounds[b + 1])
        cnt = jnp.sum(in_bin.astype(jnp.float32))
        prop = cnt / conf.shape[0]
        avg_c = jnp.where(cnt > 0,
                          jnp.sum(jnp.where(in_bin, conf, 0.0)) / jnp.maximum(cnt, 1.0), 0.0)
        avg_a = jnp.where(cnt > 0,
                          jnp.sum(jnp.where(in_bin, acc, 0.0)) / jnp.maximum(cnt, 1.0), 0.0)
        ece = ece + jnp.where(cnt > 0, jnp.abs(avg_c - avg_a) * prop, 0.0)
    return ece


if __name__ == "__main__":
    key = jax.random.PRNGKey(0)
    k1, k2, k3, k4, k5, k6 = jax.random.split(key, 6)

    # Test 1: small f32, C=8 -> lane-dense (transposed) path, single block.
    N1, C1 = 64, 8
    logits1 = jax.random.normal(k1, (N1, C1), dtype=jnp.float32) * 3.0
    labels1 = jax.random.randint(k2, (N1,), 0, C1, dtype=jnp.int32)
    ece1 = jax.block_until_ready(ece_loss(logits1, labels1, n_bins=15))
    ref1 = _ece_reference(logits1, labels1, n_bins=15)
    assert ece1.shape == (1,)
    assert jnp.allclose(ece1, ref1, atol=1e-5), (ece1, ref1)

    # Test 2: bf16 logits, ragged N; forced small tile exercises the 2-way
    # core split, the clamped/fully-masked padded chunk, and partial blocks.
    N2, C2 = 1000, 16
    logits2 = (jax.random.normal(k3, (N2, C2), dtype=jnp.float32) * 2.0
               ).astype(jnp.bfloat16)
    labels2 = jax.random.randint(k4, (N2,), 0, C2, dtype=jnp.int32)
    ref2 = _ece_reference(logits2.astype(jnp.float32), labels2, n_bins=15)
    ece2 = jax.block_until_ready(
        ece_loss(logits2, labels2, n_bins=15, _tile_override=384))
    assert jnp.allclose(ece2, ref2, atol=1e-5), (ece2, ref2)
    # Auto-tiled default path on the same data.
    ece2b = jax.block_until_ready(ece_loss(logits2, labels2, n_bins=15))
    assert jnp.allclose(ece2b, ref2, atol=1e-5), (ece2b, ref2)

    # Test 3: C >= 128 -> row-major path, ragged rows + 2-way split + padding.
    N3, C3 = 200, 160
    logits3 = jax.random.normal(k5, (N3, C3), dtype=jnp.float32)
    labels3 = jax.random.randint(k6, (N3,), 0, C3, dtype=jnp.int32)
    ref3 = _ece_reference(logits3, labels3, n_bins=15)
    ece3 = jax.block_until_ready(
        ece_loss(logits3, labels3, n_bins=15, _tile_override=72))
    assert jnp.allclose(ece3, ref3, atol=1e-5), (ece3, ref3)

    print("KERNEL_OK")
</pallas_src>

<mosaic_0001>
module attributes {stable_mosaic.version = 11 : i64} {
  func.func @_ece_lanedense_kernel(%arg0: i32, %arg1: i32, %arg2: memref<8x64xf32, #tpu.memory_space<vmem>>, %arg3: memref<1x64xi32, #tpu.memory_space<vmem>>, %arg4: memref<1x15x1xf32, #tpu.memory_space<vmem>>, %arg5: memref<1x15x1xf32, #tpu.memory_space<vmem>>, %arg6: memref<1x15x1xf32, #tpu.memory_space<vmem>>, %arg7: memref<15x1xf32, #tpu.memory_space<vmem>>, %arg8: memref<15x1xf32, #tpu.memory_space<vmem>>, %arg9: memref<15x1xf32, #tpu.memory_space<vmem>>) attributes {dimension_semantics = [#tpu.dimension_semantics<parallel>, #tpu.dimension_semantics<arbitrary>], iteration_bounds = array<i64: 1, 1>, scalar_prefetch = 0 : i64, scratch_operands = 3 : i64, tpu.core_type = #tpu.core_type<tc>, window_params = [{transform_indices = @transform_0, window_bounds = array<i64: 8, 64>}, {transform_indices = @transform_1, window_bounds = array<i64: 1, 64>}, {transform_indices = @transform_2, window_bounds = array<i64: 1, 15, 1>}, {transform_indices = @transform_3, window_bounds = array<i64: 1, 15, 1>}, {transform_indices = @transform_4, window_bounds = array<i64: 1, 15, 1>}]} {
    %c0_i32 = arith.constant 0 : i32
    %0 = arith.cmpi eq, %arg1, %c0_i32 : i32
    %1 = arith.extui %0 : i1 to i32
    %c0_i32_0 = arith.constant 0 : i32
    %2 = arith.cmpi ne, %1, %c0_i32_0 : i32
    scf.if %2 {
      %cst_29 = arith.constant 0.000000e+00 : f32
      %73 = vector.broadcast %cst_29 : f32 to vector<15x1xf32>
      %c0_30 = arith.constant 0 : index
      %c0_31 = arith.constant 0 : index
      %74 = vector.load %arg7[%c0_30, %c0_31] : memref<15x1xf32, #tpu.memory_space<vmem>>, vector<15x1xf32>
      tpu.vector_store %arg7[%c0_30, %c0_31], %73 {strides = array<i32>} : memref<15x1xf32, #tpu.memory_space<vmem>>, vector<15x1xf32>,
      %cst_32 = arith.constant 0.000000e+00 : f32
      %75 = vector.broadcast %cst_32 : f32 to vector<15x1xf32>
      %c0_33 = arith.constant 0 : index
      %c0_34 = arith.constant 0 : index
      %76 = vector.load %arg8[%c0_33, %c0_34] : memref<15x1xf32, #tpu.memory_space<vmem>>, vector<15x1xf32>
      tpu.vector_store %arg8[%c0_33, %c0_34], %75 {strides = array<i32>} : memref<15x1xf32, #tpu.memory_space<vmem>>, vector<15x1xf32>,
      %cst_35 = arith.constant 0.000000e+00 : f32
      %77 = vector.broadcast %cst_35 : f32 to vector<15x1xf32>
      %c0_36 = arith.constant 0 : index
      %c0_37 = arith.constant 0 : index
      %78 = vector.load %arg9[%c0_36, %c0_37] : memref<15x1xf32, #tpu.memory_space<vmem>>, vector<15x1xf32>
      tpu.vector_store %arg9[%c0_36, %c0_37], %77 {strides = array<i32>} : memref<15x1xf32, #tpu.memory_space<vmem>>, vector<15x1xf32>,
    } else {
    }
    %c0 = arith.constant 0 : index
    %c0_1 = arith.constant 0 : index
    %3 = vector.load %arg2[%c0, %c0_1] : memref<8x64xf32, #tpu.memory_space<vmem>>, vector<8x64xf32>
    %cst = arith.constant dense<0xFF800000> : vector<64xf32>
    %4 = vector.multi_reduction <maximumf>, %3, %cst [0] : vector<8x64xf32> to vector<64xf32>
    %5 = vector.shape_cast %4 : vector<64xf32> to vector<1x64xf32>
    %6 = vector.broadcast %5 : vector<1x64xf32> to vector<8x64xf32>
    %7 = arith.subf %3, %6 : vector<8x64xf32>
    %8 = math.exp %7 : vector<8x64xf32>
    %cst_2 = arith.constant dense<0.000000e+00> : vector<64xf32>
    %9 = vector.multi_reduction <add>, %8, %cst_2 [0] : vector<8x64xf32> to vector<64xf32>
    %10 = vector.shape_cast %9 : vector<64xf32> to vector<1x64xf32>
    %cst_3 = arith.constant 1.000000e+00 : f32
    %11 = vector.broadcast %cst_3 : f32 to vector<1x64xf32>
    %12 = arith.divf %11, %10 : vector<1x64xf32>
    %13 = tpu.iota {dimensions = array<i32: 0>} : vector<8x64xi32>
    %14 = vector.broadcast %5 : vector<1x64xf32> to vector<8x64xf32>
    %15 = arith.cmpf oeq, %3, %14 : vector<8x64xf32>
    %c8_i32 = arith.constant 8 : i32
    %16 = vector.broadcast %c8_i32 : i32 to vector<8x64xi32>
    %17 = arith.select %15, %13, %16 : vector<8x64xi1>, vector<8x64xi32>
    %cst_4 = arith.constant dense<2147483647> : vector<64xi32>
    %18 = vector.multi_reduction <minsi>, %17, %cst_4 [0] : vector<8x64xi32> to vector<64xi32>
    %19 = vector.shape_cast %18 : vector<64xi32> to vector<1x64xi32>
    %c0_5 = arith.constant 0 : index
    %c0_6 = arith.constant 0 : index
    %20 = vector.load %arg3[%c0_5, %c0_6] : memref<1x64xi32, #tpu.memory_space<vmem>>, vector<1x64xi32>
    %21 = arith.cmpi eq, %19, %20 : vector<1x64xi32>
    %22 = arith.extui %21 : vector<1x64xi1> to vector<1x64xi32>
    %23 = arith.sitofp %22 : vector<1x64xi32> to vector<1x64xf32>
    %c1_i32 = arith.constant 1 : i32
    %24 = arith.muli %arg0, %c1_i32 : i32
    %25 = arith.addi %24, %arg1 : i32
    %c64_i32 = arith.constant 64 : i32
    %26 = arith.muli %25, %c64_i32 : i32
    %27 = tpu.iota {dimensions = array<i32: 1>} : vector<1x64xi32>
    %28 = vector.broadcast %26 : i32 to vector<1x64xi32>
    %29 = arith.addi %28, %27 : vector<1x64xi32>
    %c64_i32_7 = arith.constant 64 : i32
    %30 = vector.broadcast %c64_i32_7 : i32 to vector<1x64xi32>
    %31 = arith.cmpi slt, %29, %30 : vector<1x64xi32>
    %cst_8 = arith.constant 0.000000e+00 : f32
    %32 = vector.broadcast %cst_8 : f32 to vector<1x64xf32>
    %33 = arith.select %31, %12, %32 : vector<1x64xi1>, vector<1x64xf32>
    %34 = tpu.iota {dimensions = array<i32: 0>} : vector<15x1xi32>
    %35 = arith.sitofp %34 : vector<15x1xi32> to vector<15x1xf32>
    %cst_9 = arith.constant 1.500000e+01 : f32
    %36 = vector.broadcast %cst_9 : f32 to vector<15x1xf32>
    %37 = arith.divf %35, %36 : vector<15x1xf32>
    %cst_10 = arith.constant 1.000000e+00 : f32
    %38 = vector.broadcast %cst_10 : f32 to vector<15x1xf32>
    %39 = arith.addf %35, %38 : vector<15x1xf32>
    %cst_11 = arith.constant 1.500000e+01 : f32
    %40 = vector.broadcast %cst_11 : f32 to vector<15x1xf32>
    %41 = arith.divf %39, %40 : vector<15x1xf32>
    %42 = vector.broadcast %33 : vector<1x64xf32> to vector<15x64xf32>
    %43 = vector.broadcast %37 : vector<15x1xf32> to vector<15x64xf32>
    %44 = arith.cmpf ogt, %42, %43 : vector<15x64xf32>
    %45 = vector.broadcast %33 : vector<1x64xf32> to vector<15x64xf32>
    %46 = vector.broadcast %41 : vector<15x1xf32> to vector<15x64xf32>
    %47 = arith.cmpf ole, %45, %46 : vector<15x64xf32>
    %48 = arith.andi %44, %47 : vector<15x64xi1>
    %49 = arith.extui %48 : vector<15x64xi1> to vector<15x64xi32>
    %50 = arith.sitofp %49 : vector<15x64xi32> to vector<15x64xf32>
    %c0_12 = arith.constant 0 : index
    %c0_13 = arith.constant 0 : index
    %51 = vector.load %arg7[%c0_12, %c0_13] : memref<15x1xf32, #tpu.memory_space<vmem>>, vector<15x1xf32>
    %52 = vector.broadcast %33 : vector<1x64xf32> to vector<15x64xf32>
    %53 = arith.mulf %50, %52 : vector<15x64xf32>
    %cst_14 = arith.constant dense<0.000000e+00> : vector<15xf32>
    %54 = vector.multi_reduction <add>, %53, %cst_14 [1] : vector<15x64xf32> to vector<15xf32>
    %55 = vector.shape_cast %54 : vector<15xf32> to vector<15x1xf32>
    %56 = arith.addf %51, %55 : vector<15x1xf32>
    %c0_15 = arith.constant 0 : index
    %c0_16 = arith.constant 0 : index
    %57 = vector.load %arg7[%c0_15, %c0_16] : memref<15x1xf32, #tpu.memory_space<vmem>>, vector<15x1xf32>
    tpu.vector_store %arg7[%c0_15, %c0_16], %56 {strides = array<i32>} : memref<15x1xf32, #tpu.memory_space<vmem>>, vector<15x1xf32>,
    %c0_17 = arith.constant 0 : index
    %c0_18 = arith.constant 0 : index
    %58 = vector.load %arg8[%c0_17, %c0_18] : memref<15x1xf32, #tpu.memory_space<vmem>>, vector<15x1xf32>
    %59 = vector.broadcast %23 : vector<1x64xf32> to vector<15x64xf32>
    %60 = arith.mulf %50, %59 : vector<15x64xf32>
    %cst_19 = arith.constant dense<0.000000e+00> : vector<15xf32>
    %61 = vector.multi_reduction <add>, %60, %cst_19 [1] : vector<15x64xf32> to vector<15xf32>
    %62 = vector.shape_cast %61 : vector<15xf32> to vector<15x1xf32>
    %63 = arith.addf %58, %62 : vector<15x1xf32>
    %c0_20 = arith.constant 0 : index
    %c0_21 = arith.constant 0 : index
    %64 = vector.load %arg8[%c0_20, %c0_21] : memref<15x1xf32, #tpu.memory_space<vmem>>, vector<15x1xf32>
    tpu.vector_store %arg8[%c0_20, %c0_21], %63 {strides = array<i32>} : memref<15x1xf32, #tpu.memory_space<vmem>>, vector<15x1xf32>,
    %c0_22 = arith.constant 0 : index
    %c0_23 = arith.constant 0 : index
    %65 = vector.load %arg9[%c0_22, %c0_23] : memref<15x1xf32, #tpu.memory_space<vmem>>, vector<15x1xf32>
    %cst_24 = arith.constant dense<0.000000e+00> : vector<15xf32>
    %66 = vector.multi_reduction <add>, %50, %cst_24 [1] : vector<15x64xf32> to vector<15xf32>
    %67 = vector.shape_cast %66 : vector<15xf32> to vector<15x1xf32>
    %68 = arith.addf %65, %67 : vector<15x1xf32>
    %c0_25 = arith.constant 0 : index
    %c0_26 = arith.constant 0 : index
    %69 = vector.load %arg9[%c0_25, %c0_26] : memref<15x1xf32, #tpu.memory_space<vmem>>, vector<15x1xf32>
    tpu.vector_store %arg9[%c0_25, %c0_26], %68 {strides = array<i32>} : memref<15x1xf32, #tpu.memory_space<vmem>>, vector<15x1xf32>,
    %c0_i32_27 = arith.constant 0 : i32
    %70 = arith.cmpi eq, %arg1, %c0_i32_27 : i32
    %71 = arith.extui %70 : i1 to i32
    %c0_i32_28 = arith.constant 0 : i32
    %72 = arith.cmpi ne, %71, %c0_i32_28 : i32
    scf.if %72 {
      %c0_29 = arith.constant 0 : index
      %c0_30 = arith.constant 0 : index
      %73 = vector.load %arg7[%c0_29, %c0_30] : memref<15x1xf32, #tpu.memory_space<vmem>>, vector<15x1xf32>
      %74 = vector.shape_cast %73 : vector<15x1xf32> to vector<1x15x1xf32>
      %c0_31 = arith.constant 0 : index
      %c0_32 = arith.constant 0 : index
      %c0_33 = arith.constant 0 : index
      %75 = vector.load %arg4[%c0_31, %c0_32, %c0_33] : memref<1x15x1xf32, #tpu.memory_space<vmem>>, vector<1x15x1xf32>
      tpu.vector_store %arg4[%c0_31, %c0_32, %c0_33], %74 {strides = array<i32>} : memref<1x15x1xf32, #tpu.memory_space<vmem>>, vector<1x15x1xf32>,
      %c0_34 = arith.constant 0 : index
      %c0_35 = arith.constant 0 : index
      %76 = vector.load %arg8[%c0_34, %c0_35] : memref<15x1xf32, #tpu.memory_space<vmem>>, vector<15x1xf32>
      %77 = vector.shape_cast %76 : vector<15x1xf32> to vector<1x15x1xf32>
      %c0_36 = arith.constant 0 : index
      %c0_37 = arith.constant 0 : index
      %c0_38 = arith.constant 0 : index
      %78 = vector.load %arg5[%c0_36, %c0_37, %c0_38] : memref<1x15x1xf32, #tpu.memory_space<vmem>>, vector<1x15x1xf32>
      tpu.vector_store %arg5[%c0_36, %c0_37, %c0_38], %77 {strides = array<i32>} : memref<1x15x1xf32, #tpu.memory_space<vmem>>, vector<1x15x1xf32>,
      %c0_39 = arith.constant 0 : index
      %c0_40 = arith.constant 0 : index
      %79 = vector.load %arg9[%c0_39, %c0_40] : memref<15x1xf32, #tpu.memory_space<vmem>>, vector<15x1xf32>
      %80 = vector.shape_cast %79 : vector<15x1xf32> to vector<1x15x1xf32>
      %c0_41 = arith.constant 0 : index
      %c0_42 = arith.constant 0 : index
      %c0_43 = arith.constant 0 : index
      %81 = vector.load %arg6[%c0_41, %c0_42, %c0_43] : memref<1x15x1xf32, #tpu.memory_space<vmem>>, vector<1x15x1xf32>
      tpu.vector_store %arg6[%c0_41, %c0_42, %c0_43], %80 {strides = array<i32>} : memref<1x15x1xf32, #tpu.memory_space<vmem>>, vector<1x15x1xf32>,
    } else {
    }
    return
  }
  func.func @transform_0(%arg0: i32, %arg1: i32) -> (i32, i32) {
    %c1_i32 = arith.constant 1 : i32
    %0 = arith.muli %arg0, %c1_i32 : i32
    %1 = arith.addi %0, %arg1 : i32
    %c0_i32 = arith.constant 0 : i32
    %2 = arith.minsi %1, %c0_i32 : i32
    %c0_i32_0 = arith.constant 0 : i32
    %c0_i32_1 = arith.constant 0 : i32
    return %c0_i32_0, %2 : i32, i32
  }
  func.func @transform_1(%arg0: i32, %arg1: i32) -> (i32, i32) {
    %c1_i32 = arith.constant 1 : i32
    %0 = arith.muli %arg0, %c1_i32 : i32
    %1 = arith.addi %0, %arg1 : i32
    %c0_i32 = arith.constant 0 : i32
    %2 = arith.minsi %1, %c0_i32 : i32
    %c0_i32_0 = arith.constant 0 : i32
    %c0_i32_1 = arith.constant 0 : i32
    return %c0_i32_0, %2 : i32, i32
  }
  func.func @transform_2(%arg0: i32, %arg1: i32) -> (i32, i32, i32) {
    %c0_i32 = arith.constant 0 : i32
    %c0_i32_0 = arith.constant 0 : i32
    %c0_i32_1 = arith.constant 0 : i32
    return %arg0, %c0_i32, %c0_i32_0 : i32, i32, i32
  }
  func.func @transform_3(%arg0: i32, %arg1: i32) -> (i32, i32, i32) {
    %c0_i32 = arith.constant 0 : i32
    %c0_i32_0 = arith.constant 0 : i32
    %c0_i32_1 = arith.constant 0 : i32
    return %arg0, %c0_i32, %c0_i32_0 : i32, i32, i32
  }
  func.func @transform_4(%arg0: i32, %arg1: i32) -> (i32, i32, i32) {
    %c0_i32 = arith.constant 0 : i32
    %c0_i32_0 = arith.constant 0 : i32
    %c0_i32_1 = arith.constant 0 : i32
    return %arg0, %c0_i32, %c0_i32_0 : i32, i32, i32
  }
}

</mosaic_0001>

<bundles_post_ra>
// kernel: ece_loss.1
= control target key start
LH: loop header
LB: loop body
LE: loop exit
PB: predicated region body
PF: predicated region fallthrough
CT: control target
= control target key end

     0   :  { %10 = vsyncpa [#allocation6], 0  ;;  %s250_s15 = smov [#allocation5]   ;;  %s343_s0 = inlined_call_operand.hbm [shape: f32[8,64], index: 0, kind: input, shape index: {}]   ;;  %s344_s1 = inlined_call_operand.vmem [shape: s32[1,64], index: 1, kind: input, shape index: {}]   ;;  %s345_s2 = inlined_call_operand.vmem [shape: f32[1,15,1], index: 2, kind: output, shape index: {0}]   ;;  %s346_s3 = inlined_call_operand.vmem [shape: f32[1,15,1], index: 3, kind: output, shape index: {1}]   ;;  %s347_s4 = inlined_call_operand.vmem [shape: f32[1,15,1], index: 4, kind: output, shape index: {2}]  }
   0x1   :  { %s22_s16 = sshll.u32 %s250_s15, 4  ;;  %s226_s19 = scalar_lea.hbm %s343_s0, 128  ;;  %s23_s16 = int_to_ptr.vmem [resolvable:$true] %s22_s16 }
   0x2   :  { %p227_p0 = scmp.ne.s32.totalorder %s343_s0, %s226_s19  ;;  %p230_p1 = scmp.lt.u32.totalorder %s226_s19, %s343_s0 }
   0x4   :  { %p232_p2 = pnand %p230_p1, %p227_p0 }
   0x6   :  { %235 = shalt.err (!%p232_p2)
}
   0x7   :  { %s236_s24 = scalar_lea.vmem %s23_s16, 128  ;;  %p241_p4 = scmp.lt.s32.totalorder %s23_s16, %s23_s16 }
   0x8   :  { %p237_p3 = scmp.ne.s32.totalorder %s23_s16, %s236_s24  ;;  %p242_p5 = scmp.lt.s32.totalorder %s236_s24, %s236_s24 }
   0xa   :  { %p243_p6 = por %p242_p5, %p241_p4 }
   0xc   :  { %p244_p7 = pnand %p243_p6, %p237_p3 }
   0xe   :  { %247 = shalt.err (!%p244_p7)
}
   0xf   :  { %25 = dma.hbm_to_vmem [thread:$0]  %s343_s0, 128, %s23_s16, [#allocation6]  }
  0x10   :  { %248 = dma.done.wait [#allocation6], 128  }
  0x11   :  { %249 = vsyncadd [#allocation6], 4294967168  ;;  %vm62_vm0 = vcmask 7168   ;;  %v251_v0 = vmov 0.0   ;;  %vm71_vm1 = vcmask 523264   ;;  %v70_v1 = vld [vmem:[#allocation5] sm:$0xff]  ;;  %v91_v6 = vlaneseq }
  0x12   :  { %66 = vst.msk [vmem:[#allocation3] sm:$0xff] %vm62_vm0, %v251_v0  ;;  %63 = vst.msk [vmem:[#allocation2] sm:$0xff] %vm62_vm0, %v251_v0  ;;  %v72_v2 = vsel %vm71_vm1, %v70_v1, -inf  ;;  %v105_v32 = vld [vmem:[%s344_s1] sm:$0x1]  ;;  %vm144_vm14 = vcmask 522240  }
  0x13   :  { %68 = vst.msk [vmem:[#allocation4] sm:$0xff] %vm62_vm0, %v251_v0  ;;  %v73_v3 = vrot.slane %v72_v2, 4  ;;  %v92_v9 = vshrl.u32 %v91_v6, 7  ;;  %v112_v34 = vand.u32 127, %v91_v6  ;;  %vm64_vm15 = vcmask 6144  }
  0x14   :  { %67 = vst.msk [vmem:[#allocation3 + $0x8] sm:$0x7f] %vm64_vm15, %v251_v0  ;;  %65 = vst.msk [vmem:[#allocation2 + $0x8] sm:$0x7f] %vm64_vm15, %v251_v0 }
  0x15   :  { %v74_v4 = vmax.f32 %v72_v2, %v73_v3  ;;  %v117_v27 = vadd.s32 8, %v92_v9  ;;  %v118_v29 = vcvt.s32.f32 %v92_v9  ;;  %v158_v38 = vsub.s32 0, %v92_v9  ;;  %69 = vst.msk [vmem:[#allocation4 + $0x8] sm:$0x7f] %vm64_vm15, %v251_v0 }
  0x16   :  { %vm115_vm7 = vcmp.lt.s32.totalorder %v112_v34, 64 }
  0x17   :  { %v75_v5 = vrot.slane %v74_v4, 2  ;;  %v119_v30 = vcvt.s32.f32 %v117_v27  ;;  %v123_v33 = vadd.f32 1.0, %v118_v29  ;;  %v121_v36 = vmul.f32 0.06666667, %v118_v29 }
  0x19   :  { %v76_v7 = vmax.f32 %v74_v4, %v75_v5  ;;  %v124_v35 = vadd.f32 1.0, %v119_v30  ;;  %v125_v37 = vmul.f32 0.06666667, %v123_v33  ;;  %v122_v40 = vmul.f32 0.06666667, %v119_v30  ;;  %v154_v57 = vld [vmem:[#allocation3] sm:$0xff] }
  0x1a   :  { %v137_v58 = vld [vmem:[#allocation2] sm:$0xff] }
  0x1b   :  { %v77_v8 = vrot.slane %v76_v7, 1  ;;  %v126_v41 = vmul.f32 0.06666667, %v124_v35  ;;  %v155_v63 = vld [vmem:[#allocation3 + $0x8] sm:$0x7f] }
  0x1c   :  { %v173_v6 = vld [vmem:[#allocation4 + $0x8] sm:$0x7f] }
  0x1d   :  { %v78_v10 = vmax.f32 %v76_v7, %v77_v8  ;;  %v172_v7 = vld [vmem:[#allocation4] sm:$0xff] }
  0x1f   :  { %v79_v11 = vsub.f32 %v70_v1, %v78_v10  ;;  %vm93_vm2 = vcmp.eq.f32.partialorder %v70_v1, %v78_v10  ;;  %v138_v1 = vld [vmem:[#allocation2 + $0x8] sm:$0x7f] }
  0x20   :  { %v94_v12 = vsel %vm93_vm2, %v92_v9, 8 }
  0x21   :  { %v80_v13 = vmul.f32 1.442695, %v79_v11  ;;  %v95_v14 = vsel %vm71_vm1, %v94_v12, 2147483647 }
  0x22   :  { %v96_v15 = vrot.slane %v95_v14, 4 }
  0x23   :  { %222 = vpow2.f32 %v80_v13 }
  0x24   :  { %vm97_vm3 = vcmp.lt.s32.totalorder %v95_v14, %v96_v15 }
  0x25   :  { %v98_v16 = vsel %vm97_vm3, %v95_v14, %v96_v15 }
  0x26   :  { %v99_v17 = vrot.slane %v98_v16, 2 }
  0x28   :  { %vm100_vm4 = vcmp.lt.s32.totalorder %v98_v16, %v99_v17 }
  0x29   :  { %v101_v23 = vsel %vm100_vm4, %v98_v16, %v99_v17 }
  0x2a   :  { %v102_v25 = vrot.slane %v101_v23, 1 }
  0x2c   :  { %vm103_vm5 = vcmp.lt.s32.totalorder %v101_v23, %v102_v25 }
  0x2d   :  { %v223_v18 = vpop.eup %222  ;;  %v104_v31 = vsel %vm103_vm5, %v101_v23, %v102_v25 }
  0x2e   :  { %v82_v19 = vsel %vm71_vm1, %v223_v18, 0.0  ;;  %vm106_vm6 = vcmp.eq.s32.totalorder %v104_v31, %v105_v32 }
  0x2f   :  { %v83_v20 = vrot.slane %v82_v19, 4  ;;  %v217_v39 = vsel %vm106_vm6, 1.0, %v251_v0 }
  0x30   :  { %v159_v44 = vrot.slane %v217_v39, %v158_v38 }
  0x31   :  { %v84_v21 = vadd.f32 %v83_v20, %v82_v19 }
  0x33   :  { %v85_v22 = vrot.slane %v84_v21, 2 }
  0x35   :  { %v86_v24 = vadd.f32 %v85_v22, %v84_v21 }
  0x37   :  { %v87_v26 = vrot.slane %v86_v24, 1 }
  0x39   :  { %v88_v28 = vadd.f32 %v87_v26, %v86_v24 }
  0x3b   :  { %224 = vrcp.f32 %v88_v28 }
  0x45   :  { %v225_v42 = vpop.eup %224 }
  0x46   :  { %v116_v43 = vsel %vm115_vm7, %v225_v42, 0.0 }
  0x47   :  { %vm127_vm8 = vcmp.gt.f32.partialorder %v116_v43, %v121_v36  ;;  %vm129_vm9 = vcmp.le.f32.partialorder %v116_v43, %v125_v37  ;;  %vm128_vm10 = vcmp.gt.f32.partialorder %v116_v43, %v122_v40  ;;  %vm130_vm11 = vcmp.le.f32.partialorder %v116_v43, %v126_v41 }
  0x48   :  { %vm131_vm12 = vmand %vm127_vm8, %vm129_vm9 }
  0x49   :  { %v218_v45 = vsel %vm131_vm12, 1.0, %v251_v0  ;;  %vm132_vm13 = vmand %vm128_vm10, %vm130_vm11 }
  0x4a   :  { %v160_v46 = vmul.f32 %v218_v45, %v159_v44  ;;  %v139_v47 = vmul.f32 %v218_v45, %v116_v43  ;;  %v219_v48 = vsel %vm132_vm13, 1.0, %v251_v0  ;;  %v174_v56 = vsel %vm71_vm1, %v218_v45, 0.0 }
  0x4b   :  { %v161_v49 = vmul.f32 %v219_v48, %v159_v44  ;;  %v140_v50 = vmul.f32 %v219_v48, %v116_v43  ;;  %v177_v55 = vsel %vm144_vm14, %v219_v48, 0.0 }
  0x4c   :  { %v162_v51 = vsel %vm71_vm1, %v160_v46, 0.0  ;;  %v141_v52 = vsel %vm71_vm1, %v139_v47, 0.0 }
  0x4d   :  { %163 = vadd.xlane.f32.xlu1 %v162_v51  ;;  %142 = vadd.xlane.f32.xlu0 %v141_v52  ;;  %v165_v53 = vsel %vm144_vm14, %v161_v49, 0.0  ;;  %v145_v54 = vsel %vm144_vm14, %v140_v50, 0.0 }
  0x51   :  { %166 = vadd.xlane.f32.xlu1 %v165_v53  ;;  %146 = vadd.xlane.f32.xlu0 %v145_v54 }
  0x55   :  { %178 = vadd.xlane.f32.xlu1 %v177_v55  ;;  %175 = vadd.xlane.f32.xlu0 %v174_v56 }
  0xda   :  { %v164_v59 = vpop.xlane.xlu1 %163  ;;  %v143_v60 = vpop.xlane.xlu0 %142 }
  0xdb   :  { %v168_v61 = vadd.f32 %v164_v59, %v154_v57  ;;  %v148_v62 = vadd.f32 %v143_v60, %v137_v58 }
  0xdd   :  { %170 = vst.msk [vmem:[#allocation3] sm:$0xff] %vm62_vm0, %v168_v61  ;;  %151 = vst.msk [vmem:[#allocation2] sm:$0xff] %vm62_vm0, %v148_v62 }
  0xde   :  { %v167_v2 = vpop.xlane.xlu1 %166  ;;  %v147_v3 = vpop.xlane.xlu0 %146 }
  0xdf   :  { %v169_v4 = vadd.f32 %v167_v2, %v155_v63  ;;  %v149_v5 = vadd.f32 %v147_v3, %v138_v1 }
  0xe1   :  { %171 = vst.msk [vmem:[#allocation3 + $0x8] sm:$0x7f] %vm64_vm15, %v169_v4  ;;  %153 = vst.msk [vmem:[#allocation2 + $0x8] sm:$0x7f] %vm64_vm15, %v149_v5 }
  0xe2   :  { %v179_v0 = vpop.xlane.xlu1 %178  ;;  %v176_v8 = vpop.xlane.xlu0 %175 }
  0xe3   :  { %v181_v9 = vadd.f32 %v179_v0, %v173_v6  ;;  %v180_v10 = vadd.f32 %v176_v8, %v172_v7 }
  0xe4   :  { %v191_v11 = vld [vmem:[#allocation3] sm:$0xff]  ;;  %v187_v12 = vld [vmem:[#allocation2] sm:$0xff] }
  0xe5   :  { %193 = vst.msk [vmem:[%s346_s3] sm:$0xff] %vm62_vm0, %v191_v11  ;;  %189 = vst.msk [vmem:[%s345_s2] sm:$0xff] %vm62_vm0, %v187_v12 }
  0xe6   :  { %183 = vst.msk [vmem:[#allocation4 + $0x8] sm:$0x7f] %vm64_vm15, %v181_v9 }
  0xe7   :  { %182 = vst.msk [vmem:[#allocation4] sm:$0xff] %vm62_vm0, %v180_v10 }
  0xe8   :  { %v192_v13 = vld [vmem:[#allocation3 + $0x8] sm:$0x7f]  ;;  %v188_v14 = vld [vmem:[#allocation2 + $0x8] sm:$0x7f] }
  0xe9   :  { %194 = vst.msk [vmem:[%s346_s3 + $0x8] sm:$0x7f] %vm64_vm15, %v192_v13  ;;  %190 = vst.msk [vmem:[%s345_s2 + $0x8] sm:$0x7f] %vm64_vm15, %v188_v14 }
  0xed   :  { %v196_v15 = vld [vmem:[#allocation4 + $0x8] sm:$0x7f] }
  0xee   :  { %v195_v16 = vld [vmem:[#allocation4] sm:$0xff]  ;;  %198 = vst.msk [vmem:[%s347_s4 + $0x8] sm:$0x7f] %vm64_vm15, %v196_v15 }
  0xef   :  { %197 = vst.msk [vmem:[%s347_s4] sm:$0xff] %vm62_vm0, %v195_v16 }
  0xf0   :  { %211 = vsyncpa [#allocation6], 1 }

</bundles_post_ra>
